<compile_context>
chip_gen: v6e
topology: v6e:2x2x1
jax: 0.10.0
libtpu: 0.0.40
codegen_flags: <defaults>
</compile_context>

<pallas_src>
import functools

import numpy as np
import jax
import jax.numpy as jnp
from jax.experimental import pallas as pl
from jax.experimental.pallas import tpu as pltpu

FILT_SIZE = 4
STRIDE = 2
PAD_SIZE = (FILT_SIZE - 1) // 2  # 1
# TODO(synk): kernel is specialized to the module defaults (repl pad, filt_size=4, stride=2).


def _taps():
    a = np.array([1.0, 3.0, 3.0, 1.0], dtype=np.float64)
    g = (a / a.sum()) * STRIDE                      # [0.25, 0.75, 0.75, 0.25]
    return tuple(float(v) for v in g)


def _w_interleave_matrix(w):
    """(W, 2W) matrix folding the W-direction taps, the 2x interleave and the W-edge
    replication into a single right-matmul: out_row = y_row @ M."""
    g0, g1, g2, g3 = _taps()
    m = np.zeros((w, 2 * w), dtype=np.float64)
    n = np.arange(w)
    m[n, 2 * n] += g1
    m[np.maximum(n - 1, 0), 2 * n] += g3            # out col 2n   <- y[max(n-1,0)]
    m[n, 2 * n + 1] += g2
    m[np.minimum(n + 1, w - 1), 2 * n + 1] += g0    # out col 2n+1 <- y[min(n+1,W-1)]
    return m


def _build_matrices(w, r):
    """m0: (R*W, 4*R*W) main matrix (all slots, W-taps + interleave + intra-pack H-taps).
    m1/m2: (W, 2*W) edge matrices for the H-neighbour above the first / below the last
    row of each pack (accumulated into the first / last 2W output columns)."""
    g0, g1, g2, g3 = _taps()
    mw = _w_interleave_matrix(w)
    m0 = np.zeros((r * w, 4 * r * w), dtype=np.float64)
    for s in range(r):
        base = 4 * w * s
        m0[s * w:(s + 1) * w, base:base + 2 * w] += g1 * mw            # out[2m] <- x[m]
        if s > 0:
            m0[(s - 1) * w:s * w, base:base + 2 * w] += g3 * mw        # out[2m] <- x[m-1]
        m0[s * w:(s + 1) * w, base + 2 * w:base + 4 * w] += g2 * mw    # out[2m+1] <- x[m]
        if s < r - 1:
            m0[(s + 1) * w:(s + 2) * w, base + 2 * w:base + 4 * w] += g0 * mw  # <- x[m+1]
    m1 = g3 * mw
    m2 = g0 * mw
    return (m0.astype(np.float32), m1.astype(np.float32), m2.astype(np.float32))


def _pick_row_pack(h, w, max_k=256):
    """Rows of one image packed along lanes: divisor of H, output width 4*R*W a multiple
    of 128 when possible (lane-dense stores), R*W capped to bound the matrix / MXU cost."""
    divs = [r for r in range(1, h + 1) if h % r == 0 and r * w <= max_k]
    if not divs:
        return 1
    aligned = [r for r in divs if (4 * r * w) % 128 == 0]
    if aligned:
        return min(aligned)
    wide = [r for r in divs if 4 * r * w >= 128]
    if wide:
        return min(wide)
    return max(divs)


def _vmem_limit_bytes():
    """~0.85 of the actual chip's VMEM (54 MiB on v7x, ~108 MiB on v5e/v6e)."""
    try:
        cap = int(pltpu.get_tpu_info().vmem_capacity_bytes)
    except Exception:
        cap = 64 << 20
    return max(32 << 20, int(0.85 * cap))


def _pick_images_per_block(nc, hp, rw, vmem_budget, target_in_bytes):
    """Images per grid step: divisor of nc, sublane-aligned block, ~target input bytes,
    within the VMEM budget, preferring an even grid count >= 4 (v7x megacore balance)."""
    lanes = lambda x: ((x + 127) // 128) * 128
    per_img_in = hp * lanes(rw) * 4
    per_img_out = hp * lanes(4 * rw) * 4
    per_img_vmem = 2 * (per_img_in + per_img_out) + 3 * per_img_out
    max_by_vmem = max(1, vmem_budget // per_img_vmem)
    max_by_tgt = max(1, target_in_bytes // max(1, hp * rw * 4))
    max_imgs = min(max_by_vmem, max_by_tgt)
    divisors = [b for b in range(1, nc + 1)
                if nc % b == 0 and ((b * hp) % 8 == 0 or b == nc)]
    cand = [b for b in divisors if b <= max_imgs] or [min(divisors)]
    for pred in (lambda g: g % 2 == 0 and g >= 4, lambda g: g >= 2, lambda g: True):
        good = [b for b in cand if pred(nc // b)]
        if good:
            return max(good)
    return max(cand)


def _upsample_kernel(x_ref, m0_ref, m1_ref, m2_ref, o_ref, *, hp, r, w):
    """One grid step: a block of whole images, R input rows packed per lane row.

    x_ref : (rows, R*W)    rows = B * (H/R); lane slot s holds input row m = row*R + s
    m0_ref: (R*W, 4*R*W)   main (W-taps + interleave + intra-pack H-taps)
    m1_ref: (W, 2*W)       g3 * Mw  (neighbour above the first row of each pack)
    m2_ref: (W, 2*W)       g0 * Mw  (neighbour below the last row of each pack)
    o_ref : (rows, 4*R*W)  packed output: [out[2m] | out[2m+1]] per slot m
    """
    x = x_ref[...]
    rows = x.shape[0]
    last = (r - 1) * w
    slot0 = x_ref[:, :w]                     # input row i*R     of each pack
    slot_l = x_ref[:, last:]                 # input row i*R+R-1 of each pack

    if hp == 1:
        # Whole image in one packed row: both H-neighbours clamp to the pack itself.
        prev_row = slot0
        next_row = slot_l
    else:
        # Within-image packed-row index, computed in-kernel (no HBM `pos` stream).
        pr = jax.lax.broadcasted_iota(jnp.int32, (rows, 1), 0) % hp
        prev_row = jnp.where(pr == 0, slot0,
                             pltpu.roll(slot_l, shift=1, axis=0))         # x[m-1]
        next_row = jnp.where(pr == hp - 1, slot_l,
                             pltpu.roll(slot0, shift=rows - 1, axis=0))    # x[m+1]

    # One full-width, lane-dense store of the main contribution (single MXU matmul).
    o_ref[...] = jnp.dot(x, m0_ref[...],
                         preferred_element_type=jnp.float32).astype(o_ref.dtype)
    # Edge contributions of the first / last row of each pack (tiny matmuls, VMEM RMW).
    o_ref[:, :2 * w] += jnp.dot(prev_row, m1_ref[...],
                                preferred_element_type=jnp.float32).astype(o_ref.dtype)
    o_ref[:, 4 * r * w - 2 * w:] += jnp.dot(
        next_row, m2_ref[...], preferred_element_type=jnp.float32).astype(o_ref.dtype)


def upsample(x, channels):
    """x: (N, C, H, W) float32 -> (N, C, 2H, 2W) float32, matching Upsample.forward."""
    n, c, h, w = x.shape
    assert c == channels
    if x.dtype != jnp.float32:
        # TODO(synk): bf16 path needs 16-row sublane alignment and a mixed-dtype dot.
        raise NotImplementedError("upsample kernel currently supports float32 inputs")
    nc = n * c

    r = _pick_row_pack(h, w)                  # rows packed along lanes
    hp = h // r                               # packed rows per image
    rw = r * w

    m0, m1, m2 = (jnp.asarray(m) for m in _build_matrices(w, r))
    mat_bytes = 4 * (m0.size + m1.size + m2.size)
    # TODO(synk): for very large W (>~512) the (R*W, 4*R*W) matrix should be banded /
    # W-tiled with a 1-column halo, and the constant-matrix inputs single-buffered.

    vmem_limit = _vmem_limit_bytes()
    b = _pick_images_per_block(nc, hp, rw,
                               vmem_budget=max(1, vmem_limit - 2 * mat_bytes),
                               target_in_bytes=4 << 20)
    rows = b * hp
    grid = (nc // b,)

    x2d = x.reshape(nc * hp, rw)              # pure metadata reshape (row-major packing)

    out2d = pl.pallas_call(
        functools.partial(_upsample_kernel, hp=hp, r=r, w=w),
        out_shape=jax.ShapeDtypeStruct((nc * hp, 4 * rw), x.dtype),
        grid=grid,
        in_specs=[
            pl.BlockSpec((rows, rw), lambda i: (i, 0)),          # B whole images
            pl.BlockSpec((rw, 4 * rw), lambda i: (0, 0)),        # main matrix (resident)
            pl.BlockSpec((w, 2 * w), lambda i: (0, 0)),          # top-edge matrix
            pl.BlockSpec((w, 2 * w), lambda i: (0, 0)),          # bottom-edge matrix
        ],
        out_specs=pl.BlockSpec((rows, 4 * rw), lambda i: (i, 0)),
        compiler_params=pltpu.CompilerParams(
            dimension_semantics=("parallel",),
            vmem_limit_bytes=vmem_limit,
        ),
    )(x2d, m0, m1, m2)

    # Packed row i, col r0*4W + rh*2W + ow  ==  flat ((2*(i*R+r0)+rh)*2W + ow) of the
    # image, so this reshape is a pure metadata reshape (no extra HBM pass).
    return out2d.reshape(n, c, 2 * h, 2 * w)


def ref_upsample_numpy(x):
    """Direct translation of the PyTorch forward (replication pad + conv_transpose2d)."""
    N, C, H, W = x.shape
    a = np.array([1.0, 3.0, 3.0, 1.0], dtype=np.float64)
    filt2d = a[:, None] * a[None, :]
    filt2d = filt2d / filt2d.sum() * (STRIDE ** 2)

    xp = np.pad(x.astype(np.float64), ((0, 0), (0, 0), (1, 1), (1, 1)), mode="edge")
    Hp, Wp = H + 2, W + 2
    s, p, K = STRIDE, 1 + PAD_SIZE, FILT_SIZE
    Ho = (Hp - 1) * s - 2 * p + K
    Wo = (Wp - 1) * s - 2 * p + K
    out = np.zeros((N, C, Ho, Wo), dtype=np.float64)
    for kh in range(K):
        for kw in range(K):
            oh = np.arange(Hp) * s - p + kh
            ow = np.arange(Wp) * s - p + kw
            vh = (oh >= 0) & (oh < Ho)
            vw = (ow >= 0) & (ow < Wo)
            out[:, :, oh[vh][:, None], ow[vw][None, :]] += (
                filt2d[kh, kw] * xp[:, :, vh][:, :, :, vw]
            )
    # crop [1:, 1:] then [:-1, :-1]  (filt_size even)
    return out[:, :, 1:-1, 1:-1]


if __name__ == "__main__":
    key = jax.random.PRNGKey(0)
    N, C, H, W = 2, 4, 16, 16
    x = jax.random.normal(key, (N, C, H, W), dtype=jnp.float32)

    out = upsample(x, channels=C)
    out = jax.block_until_ready(out)

    assert out.shape == (N, C, 2 * H, 2 * W), out.shape
    ref = ref_upsample_numpy(np.asarray(x))
    np.testing.assert_allclose(np.asarray(out), ref, rtol=1e-5, atol=1e-5)

    print("KERNEL_OK")
</pallas_src>

<mosaic_0001>
module attributes {stable_mosaic.version = 11 : i64} {
  func.func @_upsample_kernel(%arg0: i32, %arg1: memref<16x32xf32, #tpu.memory_space<vmem>>, %arg2: memref<32x128xf32, #tpu.memory_space<vmem>>, %arg3: memref<16x32xf32, #tpu.memory_space<vmem>>, %arg4: memref<16x32xf32, #tpu.memory_space<vmem>>, %arg5: memref<16x128xf32, #tpu.memory_space<vmem>>) attributes {dimension_semantics = [#tpu.dimension_semantics<parallel>], iteration_bounds = array<i64: 4>, scalar_prefetch = 0 : i64, scratch_operands = 0 : i64, tpu.core_type = #tpu.core_type<tc>, window_params = [{transform_indices = @transform_0, window_bounds = array<i64: 16, 32>}, {pipeline_mode = #tpu.pipeline_mode<synchronous>, transform_indices = @transform_1, window_bounds = array<i64: 32, 128>}, {pipeline_mode = #tpu.pipeline_mode<synchronous>, transform_indices = @transform_2, window_bounds = array<i64: 16, 32>}, {pipeline_mode = #tpu.pipeline_mode<synchronous>, transform_indices = @transform_3, window_bounds = array<i64: 16, 32>}, {transform_indices = @transform_4, window_bounds = array<i64: 16, 128>}]} {
    %c0 = arith.constant 0 : index
    %c0_0 = arith.constant 0 : index
    %0 = vector.load %arg1[%c0, %c0_0] : memref<16x32xf32, #tpu.memory_space<vmem>>, vector<16x32xf32>
    %c0_1 = arith.constant 0 : index
    %c0_2 = arith.constant 0 : index
    %1 = vector.load %arg1[%c0_1, %c0_2] : memref<16x32xf32, #tpu.memory_space<vmem>>, vector<16x16xf32>
    %c0_3 = arith.constant 0 : index
    %c16 = arith.constant 16 : index
    %2 = vector.load %arg1[%c0_3, %c16] : memref<16x32xf32, #tpu.memory_space<vmem>>, vector<16x16xf32>
    %3 = tpu.iota {dimensions = array<i32: 0>} : vector<16x1xi32>
    %c8_i32 = arith.constant 8 : i32
    %c0_i32 = arith.constant 0 : i32
    %4 = arith.cmpi eq, %c8_i32, %c0_i32 : i32
    %c1_i32 = arith.constant 1 : i32
    %5 = arith.select %4, %c1_i32, %c8_i32 : i32
    %6 = vector.broadcast %5 : i32 to vector<16x1xi32>
    %7 = arith.remsi %3, %6 : vector<16x1xi32>
    %c0_i32_4 = arith.constant 0 : i32
    %8 = vector.broadcast %c0_i32_4 : i32 to vector<16x1xi32>
    %9 = arith.cmpi ne, %7, %8 : vector<16x1xi32>
    %c0_i32_5 = arith.constant 0 : i32
    %10 = vector.broadcast %c0_i32_5 : i32 to vector<16x1xi32>
    %11 = arith.cmpi slt, %7, %10 : vector<16x1xi32>
    %c0_i32_6 = arith.constant 0 : i32
    %12 = arith.cmpi slt, %5, %c0_i32_6 : i32
    %13 = vector.broadcast %12 : i1 to vector<16x1xi1>
    %14 = vector.broadcast %13 : vector<16x1xi1> to vector<16x1xi1>
    %15 = arith.xori %11, %14 : vector<16x1xi1>
    %16 = arith.andi %15, %9 : vector<16x1xi1>
    %17 = vector.broadcast %5 : i32 to vector<16x1xi32>
    %18 = arith.addi %7, %17 : vector<16x1xi32>
    %19 = arith.select %16, %18, %7 : vector<16x1xi1>, vector<16x1xi32>
    %c0_i32_7 = arith.constant 0 : i32
    %20 = vector.broadcast %c0_i32_7 : i32 to vector<16x1xi32>
    %21 = arith.cmpi eq, %19, %20 : vector<16x1xi32>
    %c1_i32_8 = arith.constant 1 : i32
    %22 = tpu.dynamic_rotate %2 by %c1_i32_8 dim 0 : vector<16x16xf32>, i32 -> vector<16x16xf32>
    %23 = vector.shape_cast %21 : vector<16x1xi1> to vector<16x1xi1>
    %24 = vector.broadcast %23 : vector<16x1xi1> to vector<16x16xi1>
    %25 = arith.select %24, %1, %22 : vector<16x16xi1>, vector<16x16xf32>
    %c7_i32 = arith.constant 7 : i32
    %26 = vector.broadcast %c7_i32 : i32 to vector<16x1xi32>
    %27 = arith.cmpi eq, %19, %26 : vector<16x1xi32>
    %c15_i32 = arith.constant 15 : i32
    %28 = tpu.dynamic_rotate %1 by %c15_i32 dim 0 : vector<16x16xf32>, i32 -> vector<16x16xf32>
    %29 = vector.shape_cast %27 : vector<16x1xi1> to vector<16x1xi1>
    %30 = vector.broadcast %29 : vector<16x1xi1> to vector<16x16xi1>
    %31 = arith.select %30, %2, %28 : vector<16x16xi1>, vector<16x16xf32>
    %c0_9 = arith.constant 0 : index
    %c0_10 = arith.constant 0 : index
    %32 = vector.load %arg2[%c0_9, %c0_10] : memref<32x128xf32, #tpu.memory_space<vmem>>, vector<32x128xf32>
    %cst = arith.constant dense<0.000000e+00> : vector<16x128xf32>
    %33 = tpu.matmul %0, %32, %cst {dimension_numbers = #tpu.dot_dimension_numbers<[1], [0], [0], [1], [0, 0, 1, 1], [], []>} : vector<16x32xf32>, vector<32x128xf32>, vector<16x128xf32> -> vector<16x128xf32>
    %c0_11 = arith.constant 0 : index
    %c0_12 = arith.constant 0 : index
    %34 = vector.load %arg5[%c0_11, %c0_12] : memref<16x128xf32, #tpu.memory_space<vmem>>, vector<16x128xf32>
    tpu.vector_store %arg5[%c0_11, %c0_12], %33 {strides = array<i32>} : memref<16x128xf32, #tpu.memory_space<vmem>>, vector<16x128xf32>,
    %c0_13 = arith.constant 0 : index
    %c0_14 = arith.constant 0 : index
    %35 = vector.load %arg5[%c0_13, %c0_14] : memref<16x128xf32, #tpu.memory_space<vmem>>, vector<16x32xf32>
    %c0_15 = arith.constant 0 : index
    %c0_16 = arith.constant 0 : index
    %36 = vector.load %arg3[%c0_15, %c0_16] : memref<16x32xf32, #tpu.memory_space<vmem>>, vector<16x32xf32>
    %cst_17 = arith.constant dense<0.000000e+00> : vector<16x32xf32>
    %37 = tpu.matmul %25, %36, %cst_17 {dimension_numbers = #tpu.dot_dimension_numbers<[1], [0], [0], [1], [0, 0, 1, 1], [], []>} : vector<16x16xf32>, vector<16x32xf32>, vector<16x32xf32> -> vector<16x32xf32>
    %38 = arith.addf %35, %37 : vector<16x32xf32>
    %c0_18 = arith.constant 0 : index
    %c0_19 = arith.constant 0 : index
    %39 = vector.load %arg5[%c0_18, %c0_19] : memref<16x128xf32, #tpu.memory_space<vmem>>, vector<16x32xf32>
    tpu.vector_store %arg5[%c0_18, %c0_19], %38 {strides = array<i32>} : memref<16x128xf32, #tpu.memory_space<vmem>>, vector<16x32xf32>,
    %c0_20 = arith.constant 0 : index
    %c96 = arith.constant 96 : index
    %40 = vector.load %arg5[%c0_20, %c96] : memref<16x128xf32, #tpu.memory_space<vmem>>, vector<16x32xf32>
    %c0_21 = arith.constant 0 : index
    %c0_22 = arith.constant 0 : index
    %41 = vector.load %arg4[%c0_21, %c0_22] : memref<16x32xf32, #tpu.memory_space<vmem>>, vector<16x32xf32>
    %cst_23 = arith.constant dense<0.000000e+00> : vector<16x32xf32>
    %42 = tpu.matmul %31, %41, %cst_23 {dimension_numbers = #tpu.dot_dimension_numbers<[1], [0], [0], [1], [0, 0, 1, 1], [], []>} : vector<16x16xf32>, vector<16x32xf32>, vector<16x32xf32> -> vector<16x32xf32>
    %43 = arith.addf %40, %42 : vector<16x32xf32>
    %c0_24 = arith.constant 0 : index
    %c96_25 = arith.constant 96 : index
    %44 = vector.load %arg5[%c0_24, %c96_25] : memref<16x128xf32, #tpu.memory_space<vmem>>, vector<16x32xf32>
    tpu.vector_store %arg5[%c0_24, %c96_25], %43 {strides = array<i32>} : memref<16x128xf32, #tpu.memory_space<vmem>>, vector<16x32xf32>,
    return
  }
  func.func @transform_0(%arg0: i32) -> (i32, i32) {
    %c0_i32 = arith.constant 0 : i32
    %c0_i32_0 = arith.constant 0 : i32
    return %arg0, %c0_i32 : i32, i32
  }
  func.func @transform_1(%arg0: i32) -> (i32, i32) {
    %c0_i32 = arith.constant 0 : i32
    %c0_i32_0 = arith.constant 0 : i32
    %c0_i32_1 = arith.constant 0 : i32
    return %c0_i32, %c0_i32_0 : i32, i32
  }
  func.func @transform_2(%arg0: i32) -> (i32, i32) {
    %c0_i32 = arith.constant 0 : i32
    %c0_i32_0 = arith.constant 0 : i32
    %c0_i32_1 = arith.constant 0 : i32
    return %c0_i32, %c0_i32_0 : i32, i32
  }
  func.func @transform_3(%arg0: i32) -> (i32, i32) {
    %c0_i32 = arith.constant 0 : i32
    %c0_i32_0 = arith.constant 0 : i32
    %c0_i32_1 = arith.constant 0 : i32
    return %c0_i32, %c0_i32_0 : i32, i32
  }
  func.func @transform_4(%arg0: i32) -> (i32, i32) {
    %c0_i32 = arith.constant 0 : i32
    %c0_i32_0 = arith.constant 0 : i32
    return %arg0, %c0_i32 : i32, i32
  }
}

</mosaic_0001>

<bundles_post_ra>
// kernel: tpu_custom_call.1
= control target key start
LH: loop header
LB: loop body
LE: loop exit
PB: predicated region body
PF: predicated region fallthrough
CT: control target
= control target key end

     0   :  { %9 = vsyncpa [#allocation3], 0  ;;  %s973_s0 = inlined_call_operand.vmem [shape: f32[64,32], index: 0, kind: input, shape index: {}]   ;;  %s974_s1 = inlined_call_operand.vmem [shape: f32[32,128], index: 1, kind: input, shape index: {}]   ;;  %s975_s2 = inlined_call_operand.vmem [shape: f32[16,32], index: 2, kind: input, shape index: {}]   ;;  %s976_s3 = inlined_call_operand.vmem [shape: f32[16,32], index: 3, kind: input, shape index: {}]   ;;  %s977_s4 = inlined_call_operand.hbm [shape: f32[64,128], index: 4, kind: output, shape index: {}]  }
   0x1   :  { %11 = vsyncpa [#allocation3 + $0x1], 0  ;;  %s819_s15 = smov 0   ;;  %s821_s16 = smov 0  }
   0x2   :  { %s823_s17 = smov 0   ;;  %s825_s18 = smov 0  }
   0x3 LB: > { %s840_s19 = sadd.s32 4294967295, %s786_s18   ;;  %s624_s20 = sadd.s32 4294967294, %s786_s18   ;;  %s786_s18 = sphi %s825_s18, %s983_s18   ;;  %s782_s17 = sphi %s823_s17, %s982_s17   ;;  %s778_s16 = sphi %s821_s16, %s981_s16   ;;  %s774_s15 = sphi %s819_s15, %s980_s15  }
   0x4   : > { %s844_s21 = sadd.s32 1, %s786_s18   ;;  %s113_s22 = sadd.s32 1, %s782_s17 }
   0x5   : > { %s110_s23 = ssub.s32 %s786_s18, %s844_s21  ;;  %p123_p0 = scmp.ne.s32.totalorder %s782_s17, %s778_s16 }
   0x6   : > { %p111_p1 = scmp.eq.s32.totalorder %s110_s23, 0  ;;  %p124_p2 = scmp.eq.s32.totalorder %s840_s19, 3 }
   0x7   : > { %p129_p3 = scmp.ne.s32.totalorder %s778_s16, %s774_s15  ;;  %p130_p4 = scmp.eq.s32.totalorder %s624_s20, 3 }
   0x8   : > { %s855_s24 = scalar_select %p111_p1, %s782_s17, %s113_s22  }
   0x9   : > { %p857_p5 = por %p124_p2, %p123_p0  ;;  %p861_p6 = por %p130_p4, %p129_p3 }
   0xa   : > { %p627_p7 = scmp.ge.s32.totalorder %s786_s18, 1  ;;  %p166_p8 = scmp.lt.s32.totalorder %s786_s18, 5 }
   0xc   : > { %p167_p9 = pnand %p627_p7, %p166_p8 }
   0xd   : > { %s629_s27 = sshll.u32 (!%p167_p9), %s840_s19, 1  ;;  %s789_s30 = smov (!%p167_p9), 16  }
   0xe   : > { %170 = sbr.rel (%p167_p9) target bundleno = 587 (0x24b), region = 36  ;;  %p193_p10 = scmp.lt.s32.totalorder (!%p167_p9), %s629_s27, 7 }
   0xf   : > { %s189_s7 = sand.u32 (!%p167_p9), 1, %s778_s16   ;;  %s790_s10 = smov (!%p167_p9), 96  }
  0x10   : > { %s642_s11 = sshll.u32 (!%p167_p9), %s840_s19, 8  ;;  %s933_s19 = scalar_lea.sflag (!%p167_p9), [#allocation3], %s189_s7 }
  0x11   : > { %s791_s23 = smov (!%p167_p9), [#allocation2]  }
  0x13   : > { %v201_v0 = vlaneseq  ;;  %s985_s27 = smov (!%p193_p10, %s629_s27), 7  ;;  %v273_v2 = vld [vmem:[%s974_s1 + $0x18] sm:$0xff]  ;;  %v272_v3 = vld [vmem:[%s974_s1 + $0x10] sm:$0xff]  ;;  %v359_v4 = vld [vmem:[%s975_s2 + $0x8] sm:$0xff]  ;;  %vm274_vm0 = vcmask 261120   ;;  %vm360_vm7 = vcmask 130048  }
  0x14   : > { %657 = vmatprep.subr.mxu0 %v273_v2  ;;  %s630_s8 = sshll.u32 %s985_s27, 3  ;;  %v271_v5 = vld [vmem:[%s974_s1 + $0x8] sm:$0xff]  ;;  %668 = vmatprep.subr.mxu1 %v359_v4  ;;  %v358_v6 = vld [vmem:[%s975_s2] sm:$0xff]  ;;  %s788_s27 = smov 112   ;;  %vm545_vm8 = vcmask 1048320  }
  0x15   : > { %v202_v1 = vshrl.u32 %v201_v0, 7  ;;  %658 = vmatpush3.msra.mxu0 %v273_v2  ;;  %s196_s20 = scalar_lea.vmem %s973_s0, %s630_s8  ;;  %669 = vmatpush3.msra.mxu1 %v359_v4  ;;  %v270_v9 = vld [vmem:[%s974_s1] sm:$0xff]  ;;  %v449_v13 = vld [vmem:[%s976_s3 + $0x8] sm:$0xff]  ;;  %s628_s8 = sshll.u32 %s189_s7, 4 }
  0x16   : > { %659 = vmatprep.subr.mxu0 %v272_v3  ;;  %v199_v7 = vld [vmem:[%s196_s20] sm:$0xff]  ;;  %v200_v8 = vld [vmem:[%s196_s20 + $0x8] sm:$0xff]  ;;  %670 = vmatprep.subr.mxu1 %v358_v6  ;;  %s908_s9 = scalar_lea.vmem [#allocation2], %s628_s8  ;;  %s925_s20 = scalar_lea.hbm %s977_s4, %s642_s11 }
  0x17   : > { %vm253_vm1 = vcmp.lt.s32.totalorder %v202_v1, 7  ;;  %660 = vmatpush3.msra.mxu0 %v272_v3  ;;  %v251_v10 = vrot.slane %v199_v7, 1  ;;  %v252_v11 = vrot.slane %v200_v8, 1  ;;  %232 = vrot.lane.b32.xlu1 %v199_v7, %s788_s27  ;;  %v208_v15 = vand.u32 7, %v202_v1  ;;  %v448_v30 = vld [vmem:[%s976_s3] sm:$0xff]  ;;  %s562_s12 = sshll.u32 %s908_s9, 4  ;;  %s927_s12 = int_to_ptr.vmem [resolvable:$true] %s562_s12 }
  0x18   : > { %661 = vmatprep.subr.mxu0 %v271_v5  ;;  %665 = vmatprep.mubr.msk.f32.mxu0 %vm274_vm0, %v199_v7  ;;  %v203_v16 = vadd.s32 8, %v202_v1  ;;  %vm240_vm3 = vcmp.lt.s32.totalorder %v202_v1, 1  ;;  %s726_s22 = scalar_lea.vmem %s927_s12, 256 }
  0x19   : > { %662 = vmatpush3.msra.mxu0 %v271_v5  ;;  %v254_v12 = vsel %vm253_vm1, %v251_v10, %v252_v11  ;;  %671 = vmatpush3.msra.mxu1 %v358_v6  ;;  %v255_v14 = vsel %vm253_vm1, %v252_v11, %v251_v10  ;;  %vm249_vm2 = vcmp.eq.s32.totalorder %v208_v15, 7  ;;  %vm228_vm5 = vcmp.eq.s32.totalorder %v208_v15, 0  ;;  %p727_p11 = scmp.ne.s32.totalorder %s927_s12, %s726_s22 }
  0x1a   : > { %663 = vmatprep.subr.mxu0 %v270_v9  ;;  %262 = vrot.lane.b32.xlu0 %v254_v12, %s789_s30  ;;  %v215_v18 = vand.u32 7, %v203_v16 }
  0x1b   : > { %664 = vmatpush3.msra.mxu0 %v270_v9  ;;  %234 = vrot.lane.b32.xlu1 %v200_v8, %s788_s27  ;;  %p728_p12 = pnand %p727_p11, %p857_p5 }
  0x1c   : > { %666 = vmatmul.mubr.msk.f32.vlgmr.msra.gmra.mxu0 %vm274_vm0, %v200_v8  ;;  %675 = vmatprep.subr.mxu1 %v449_v13  ;;  %vm250_vm4 = vcmp.eq.s32.totalorder %v215_v18, 7  ;;  %vm229_vm6 = vcmp.eq.s32.totalorder %v215_v18, 0 }
  0x1d   : > { %p729_p13 = pneg %p728_p12 }
  0x1e   : > { %264 = vrot.lane.b32.xlu0 %v255_v14, %s789_s30 }
  0x89   : > { %v233_v17 = vpop.permute.xlu1 %232 }
  0x8a   : > { %v238_v20 = vrot.slane %v233_v17, 7 }
  0x8c   : > { %v263_v19 = vpop.permute.xlu0 %262 }
  0x8d   : > { %v268_v21 = vsel %vm249_vm2, %v199_v7, %v263_v19  ;;  %v235_v22 = vpop.permute.xlu1 %234 }
  0x8e   : > { %452 = vrot.lane.b32.xlu0 %v268_v21, %s788_s27  ;;  %v239_v23 = vrot.slane %v235_v22, 7 }
  0x90   : > { %v265_v24 = vpop.permute.xlu0 %264  ;;  %v241_v25 = vsel %vm240_vm3, %v238_v20, %v239_v23  ;;  %v242_v26 = vsel %vm240_vm3, %v239_v23, %v238_v20 }
  0x91   : > { %v269_v27 = vsel %vm250_vm4, %v200_v8, %v265_v24  ;;  %v247_v28 = vsel %vm228_vm5, %v199_v7, %v242_v26  ;;  %v248_v29 = vsel %vm229_vm6, %v200_v8, %v241_v25 }
  0x92   : > { %454 = vrot.lane.b32.xlu1 %v269_v27, %s788_s27  ;;  %672 = vmatprep.mubr.msk.f32.mxu1 %vm360_vm7, %v247_v28  ;;  %s730_s27 = sshll.u32 %s791_s23, 4  ;;  %s731_s27 = int_to_ptr.vmem [resolvable:$false] %s730_s27 }
  0x93   : > { %673 = vmatmul.mubr.msk.f32.vlgmr.msra.gmra.mxu1 %vm360_vm7, %v248_v29  ;;  %s732_s28 = scalar_lea.vmem %s731_s27, 512  ;;  %p733_p0 = scmp.lt.s32.totalorder %s927_s12, %s731_s27 }
  0x94   : > { %676 = vmatpush3.msra.mxu1 %v449_v13  ;;  %p734_p1 = scmp.lt.s32.totalorder %s732_s28, %s726_s22 }
  0x95   : > { %677 = vmatprep.subr.mxu1 %v448_v30 }
  0x96   : > { %678 = vmatpush3.msra.mxu1 %v448_v30  ;;  %p735_p2 = por %p734_p1, %p733_p0 }
  0x98   : > { %p736_p3 = pnand %p735_p2, %p729_p13 }
  0xdc   : > { %v667_v31 = vpop.f32.mrf.mxu0 }
  0xdd   : > { %355 = vst [vmem:[%s908_s9 + $0x8] sm:$0xff] %v667_v31 }
  0xde   : > { %v345_v32 = vpop.f32.mrf.mxu0 }
  0xdf   : > { %354 = vst [vmem:[%s908_s9] sm:$0xff] %v345_v32 }
 0x100   : > { %v453_v33 = vpop.permute.xlu0 %452 }
 0x101   : > { %679 = vmatprep.mubr.msk.f32.mxu1 %vm360_vm7, %v453_v33 }
 0x104   : > { %v455_v34 = vpop.permute.xlu1 %454 }
 0x105   : > { %680 = vmatmul.mubr.msk.f32.vlgmr.msra.gmra.mxu1 %vm360_vm7, %v455_v34 }
 0x153   : > { %v674_v35 = vpop.f32.mrf.mxu1 }
 0x154   : > { %v443_v36 = vadd.f32 %v674_v35, %v667_v31 }
 0x155   : > { %v433_v37 = vpop.f32.mrf.mxu1 }
 0x156   : > { %445 = vst.msk [vmem:[%s908_s9 + $0x8] sm:$0xff] %vm274_vm0, %v443_v36  ;;  %v442_v38 = vadd.f32 %v433_v37, %v345_v32 }
 0x158   : > { %444 = vst.msk [vmem:[%s908_s9] sm:$0xff] %vm274_vm0, %v442_v38 }
 0x15d   : > { %v447_v42 = vld [vmem:[%s908_s9 + $0x8] sm:$0xff] }
 0x15f   : > { %v446_v45 = vld [vmem:[%s908_s9] sm:$0xff] }
 0x1c5   : > { %v681_v39 = vpop.f32.mrf.mxu1 }
 0x1c6   : > { %539 = vrot.lane.b32.xlu1 %v681_v39, %s790_s10 }
 0x1c7   : > { %v526_v40 = vpop.f32.mrf.mxu1 }
 0x1c8   : > { %537 = vrot.lane.b32.xlu0 %v526_v40, %s790_s10 }
 0x238   : > { %v540_v41 = vpop.permute.xlu1 %539 }
 0x239   : > { %v544_v43 = vadd.f32 %v540_v41, %v447_v42 }
 0x23a   : > { %v538_v44 = vpop.permute.xlu0 %537 }
 0x23b   : > { %547 = vst.msk [vmem:[%s908_s9 + $0x8] sm:$0xff] %vm545_vm8, %v544_v43  ;;  %v543_v46 = vadd.f32 %v538_v44, %v446_v45 }
 0x23d   : > { %546 = vst.msk [vmem:[%s908_s9] sm:$0xff] %vm545_vm8, %v543_v46 }
 0x23e   : > { %739 = shalt.err (!%p736_p3)
}
 0x23f   : > { %s740_s29 = scalar_lea.hbm %s925_s20, 256  ;;  %s744_s6 = scalar_lea.hbm %s977_s4, 1024 }
 0x240   : > { %p741_p4 = scmp.ne.s32.totalorder %s925_s20, %s740_s29  ;;  %p745_p9 = scmp.lt.s32.totalorder %s925_s20, %s977_s4 }
 0x241   : > { %p746_p10 = scmp.lt.s32.totalorder %s744_s6, %s740_s29 }
 0x242   : > { %p742_p7 = pnand %p741_p4, %p857_p5 }
 0x243   : > { %p747_p11 = por %p746_p10, %p745_p9 }
 0x244   : > { %p743_p8 = pneg %p742_p7 }
 0x246   : > { %p748_p12 = pnand %p747_p11, %p743_p8 }
 0x248   : > { %751 = shalt.err (!%p748_p12)
}
 0x249   : > { %s792_s9 = smov 128   ;;  %s793_s10 = smov 8  }
 0x24a   : > { %682 = dma.vmem_to_hbm [thread:$0]  (%p857_p5), %s927_s12, 256, %s925_s20, %s933_s19, %s792_s9, %s792_s9, %s793_s10  }
 0x24b PF: > { %p688_p13 = scmp.ge.s32.totalorder %s786_s18, 2  ;;  %s577_s11 = sand.u32 1, %s774_s15  }
 0x24c   : > { %s578_s13 = scalar_lea.sflag [#allocation3], %s577_s11 }
 0x24d   : > { %p685_p0 = pnand %p688_p13, %p861_p6 }
 0x24f   : > { %p686_p1 = pneg %p685_p0 }
 0x251   : > { %769 = dma.done.wait (%p686_p1), %s578_s13, 256  }
 0x252   : > { %771 = vsyncadd (%p686_p1), %s578_s13, 4294967040  ;;  %p14_p2 = scmp.ge.s32.totalorder %s844_s21, 6   ;;  %s980_s15 = smov %s778_s16 }
 0x253   : > { %s981_s16 = smov %s782_s17  ;;  %s982_s17 = smov %s855_s24 }
 0x254   : > { %s983_s18 = smov %s844_s21  ;;  %16 = sbr.rel (!%p14_p2) target bundleno = 3 (0x3), region = 71 }
 0x259   :  { %583 = vsyncpa [#allocation3], 1 }
 0x25a   :  { %585 = vsyncpa [#allocation3 + $0x1], 1 }

</bundles_post_ra>
